<compile_context>
chip_gen: v5e
topology: v5e:2x2
jax: 0.10.0
libtpu: 0.0.40
codegen_flags: <defaults>
</compile_context>

<pallas_src>
import math

import jax
import jax.numpy as jnp
from jax import lax
from jax.experimental import pallas as pl
from jax.experimental.pallas import tpu as pltpu

M = 4  # angular margin (module default), phiflag=True path

# cos thresholds for k = floor(m * acos(c) / pi), computed without acos:
# k = #{ j in 1..m : acos(c) >= j*pi/m } = #{ j : c <= cos(j*pi/m) }
_THRESHOLDS = tuple(float(math.cos(j * math.pi / M)) for j in range(1, M + 1))


def _round_up(x, mult):
    return ((x + mult - 1) // mult) * mult


def angle_linear_kernel(x_ref, w_ref, inv_wlen_ref, cos_ref, phi_ref):
    x = x_ref[...]                 # (TM, IN)  f32
    w = w_ref[...]                 # (IN, TN)  f32 (raw weight block; renorm scale cancels)
    inv_wlen = inv_wlen_ref[...]   # (1, TN)   f32 (precomputed 1/||w_col||)

    # Row squared norms -> rsqrt on the EUP; xlen needed only for the final scaling.
    xsq = jnp.sum(x * x, axis=1, keepdims=True)        # (TM, 1)
    inv_xlen = lax.rsqrt(xsq)                           # EUP slot
    xlen = jnp.sqrt(xsq)                                # per-row only, negligible

    # Cosine similarity via MXU matmul; all normalization is multiplies (no divides).
    xw = jnp.dot(x, w, preferred_element_type=jnp.float32)   # (TM, TN)
    cos_theta = xw * inv_xlen * inv_wlen
    cos_theta = jnp.clip(cos_theta, -1.0, 1.0)

    # cos(m*theta), m = 4: Chebyshev polynomial 8c^4 - 8c^2 + 1  (self.mlambda[4])
    c2 = cos_theta * cos_theta
    cos_m_theta = 8.0 * c2 * c2 - 8.0 * c2 + 1.0

    # k = floor(m * theta / pi) without acos: count quadrant thresholds crossed.
    k_i = (cos_theta <= _THRESHOLDS[0]).astype(jnp.int32)
    for t in _THRESHOLDS[1:]:
        k_i = k_i + (cos_theta <= t).astype(jnp.int32)
    k_f = k_i.astype(jnp.float32)

    # (-1)^k via parity select
    sign = jnp.where((k_i & 1) == 0, jnp.float32(1.0), jnp.float32(-1.0))
    phi_theta = sign * cos_m_theta - 2.0 * k_f

    cos_ref[...] = (cos_theta * xlen).astype(cos_ref.dtype)
    phi_ref[...] = (phi_theta * xlen).astype(phi_ref.dtype)


def angle_linear(x, weight, *, tm=None, tn=None):
    """Forward of AngleLinear(in_features, out_features, m=4, phiflag=True).

    x:      (B, in_features)  float32
    weight: (in_features, out_features) float32 (raw parameter, as in __init__)
    returns (cos_theta, phi_theta), each (B, out_features) float32
    """
    B, in_features = x.shape
    in_w, out_features = weight.shape
    assert in_w == in_features

    # ww = weight.renorm(2, 1, 1e-5).mul(1e5) scales each column by a positive factor,
    # which cancels exactly in cos_theta = (x @ ww) / (xlen * ||ww_col||).  So we feed the
    # raw weight and only precompute the inverse column norms (tiny side input).
    wlen = jnp.sqrt(jnp.sum(weight * weight, axis=0, keepdims=True))   # (1, OUT)
    inv_wlen = 1.0 / wlen   # same div-by-zero hazard as the PyTorch reference

    # Tile sizes: TM multiple of 8, TN multiple of 128 (lane-dense outputs).
    if tm is None:
        tm = min(_round_up(B, 8), 128)
    if tn is None:
        tn = min(_round_up(out_features, 128), 512)

    Bp = _round_up(B, tm)
    OUTp = _round_up(out_features, tn)

    x_p = x if Bp == B else jnp.pad(x, ((0, Bp - B), (0, 0)))
    w_p = weight if OUTp == out_features else jnp.pad(
        weight, ((0, 0), (0, OUTp - out_features)))
    iw_p = inv_wlen if OUTp == out_features else jnp.pad(
        inv_wlen, ((0, 0), (0, OUTp - out_features)), constant_values=1.0)

    grid = (Bp // tm, OUTp // tn)

    cost = pl.CostEstimate(
        flops=2 * Bp * in_features * OUTp,
        transcendentals=Bp * grid[1],
        bytes_accessed=4 * (x_p.size + w_p.size + iw_p.size + 2 * Bp * OUTp),
    )

    grid_spec = pl.GridSpec(
        grid=grid,
        in_specs=[
            pl.BlockSpec((tm, in_features), lambda i, j: (i, 0)),   # x rows
            pl.BlockSpec((in_features, tn), lambda i, j: (0, j)),   # weight columns (dominant stream)
            pl.BlockSpec((1, tn), lambda i, j: (0, j)),             # 1/wlen
        ],
        out_specs=[
            pl.BlockSpec((tm, tn), lambda i, j: (i, j)),
            pl.BlockSpec((tm, tn), lambda i, j: (i, j)),
        ],
    )

    cos_theta, phi_theta = pl.pallas_call(
        angle_linear_kernel,
        out_shape=(
            jax.ShapeDtypeStruct((Bp, OUTp), jnp.float32),
            jax.ShapeDtypeStruct((Bp, OUTp), jnp.float32),
        ),
        grid_spec=grid_spec,
        compiler_params=pltpu.CompilerParams(
            dimension_semantics=("parallel", "parallel"),
        ),
        cost_estimate=cost,
    )(x_p, w_p, iw_p)

    if Bp != B or OUTp != out_features:
        cos_theta = cos_theta[:B, :out_features]
        phi_theta = phi_theta[:B, :out_features]
    return cos_theta, phi_theta


def _reference(x, weight):
    """Pure-JAX transcription of the PyTorch forward (phiflag=True, m=4)."""
    col_norm = jnp.sqrt(jnp.sum(weight * weight, axis=0, keepdims=True))
    factor = jnp.where(col_norm > 1e-5, 1e-5 / (col_norm + 1e-7), 1.0)
    ww = weight * factor * 1e5
    xlen = jnp.sqrt(jnp.sum(x * x, axis=1, keepdims=True))
    wlen = jnp.sqrt(jnp.sum(ww * ww, axis=0, keepdims=True))
    cos_n = jnp.clip((x @ ww) / xlen / wlen, -1.0, 1.0)
    cos_m = 8.0 * cos_n ** 4 - 8.0 * cos_n ** 2 + 1.0
    theta = jnp.arccos(cos_n)
    k = jnp.floor(M * theta / 3.14159265)
    sign = jnp.where(jnp.mod(k, 2.0) == 0.0, 1.0, -1.0)   # (-1)^k for integer-valued k
    phi_n = sign * cos_m - 2.0 * k
    return cos_n * xlen, phi_n * xlen, cos_n


# TODO(synk): the phiflag=False branch (myphi Taylor series) of the module is not
# implemented; this kernel covers the default configuration (m=4, phiflag=True).


if __name__ == "__main__":
    key = jax.random.PRNGKey(0)
    k_x, k_w = jax.random.split(key)

    B, IN_FEATURES, OUT_FEATURES = 10, 64, 200   # small, exercises padding + 2x2 grid

    x = jax.random.normal(k_x, (B, IN_FEATURES), dtype=jnp.float32)
    # weight.data.uniform_(-1, 1); the renorm/mul is folded away (scale cancels).
    weight = jax.random.uniform(
        k_w, (IN_FEATURES, OUT_FEATURES), dtype=jnp.float32, minval=-1.0, maxval=1.0
    )

    cos_theta, phi_theta = angle_linear(x, weight, tm=8, tn=128)
    jax.block_until_ready((cos_theta, phi_theta))

    assert cos_theta.shape == (B, OUT_FEATURES)
    assert phi_theta.shape == (B, OUT_FEATURES)
    assert bool(jnp.all(jnp.isfinite(cos_theta)))
    assert bool(jnp.all(jnp.isfinite(phi_theta)))

    # Numerical check against a pure-JAX transcription of the PyTorch forward.
    cos_ref, phi_ref, cos_n_ref = _reference(x, weight)
    assert bool(jnp.allclose(cos_theta, cos_ref, rtol=2e-5, atol=2e-4))
    # phi has a discrete quadrant index k; compare only away from the k thresholds.
    thr = jnp.asarray(_THRESHOLDS, dtype=jnp.float32)
    dist = jnp.min(jnp.abs(cos_n_ref[..., None] - thr), axis=-1)
    mask = dist > 1e-3
    assert bool(jnp.allclose(jnp.where(mask, phi_theta, 0.0),
                             jnp.where(mask, phi_ref, 0.0),
                             rtol=2e-5, atol=2e-4))

    print("KERNEL_OK")
</pallas_src>

<mosaic_0001>
module attributes {stable_mosaic.version = 11 : i64} {
  func.func @angle_linear_kernel(%arg0: i32, %arg1: i32, %arg2: memref<8x64xf32, #tpu.memory_space<vmem>>, %arg3: memref<64x128xf32, #tpu.memory_space<vmem>>, %arg4: memref<1x128xf32, #tpu.memory_space<vmem>>, %arg5: memref<8x128xf32, #tpu.memory_space<vmem>>, %arg6: memref<8x128xf32, #tpu.memory_space<vmem>>) attributes {dimension_semantics = [#tpu.dimension_semantics<parallel>, #tpu.dimension_semantics<parallel>], iteration_bounds = array<i64: 2, 2>, scalar_prefetch = 0 : i64, scratch_operands = 0 : i64, tpu.core_type = #tpu.core_type<tc>, window_params = [{transform_indices = @transform_0, window_bounds = array<i64: 8, 64>}, {transform_indices = @transform_1, window_bounds = array<i64: 64, 128>}, {transform_indices = @transform_2, window_bounds = array<i64: 1, 128>}, {transform_indices = @transform_3, window_bounds = array<i64: 8, 128>}, {transform_indices = @transform_4, window_bounds = array<i64: 8, 128>}]} {
    %c0 = arith.constant 0 : index
    %c0_0 = arith.constant 0 : index
    %0 = vector.load %arg2[%c0, %c0_0] : memref<8x64xf32, #tpu.memory_space<vmem>>, vector<8x64xf32>
    %c0_1 = arith.constant 0 : index
    %c0_2 = arith.constant 0 : index
    %1 = vector.load %arg3[%c0_1, %c0_2] : memref<64x128xf32, #tpu.memory_space<vmem>>, vector<64x128xf32>
    %c0_3 = arith.constant 0 : index
    %c0_4 = arith.constant 0 : index
    %2 = vector.load %arg4[%c0_3, %c0_4] : memref<1x128xf32, #tpu.memory_space<vmem>>, vector<1x128xf32>
    %3 = arith.mulf %0, %0 : vector<8x64xf32>
    %cst = arith.constant dense<0.000000e+00> : vector<8xf32>
    %4 = vector.multi_reduction <add>, %3, %cst [1] : vector<8x64xf32> to vector<8xf32>
    %5 = vector.shape_cast %4 : vector<8xf32> to vector<8x1xf32>
    %6 = math.rsqrt %5 : vector<8x1xf32>
    %7 = math.sqrt %5 : vector<8x1xf32>
    %cst_5 = arith.constant dense<0.000000e+00> : vector<8x128xf32>
    %8 = tpu.matmul %0, %1, %cst_5 {dimension_numbers = #tpu.dot_dimension_numbers<[1], [0], [0], [1], [0, 0, 1, 1], [], []>} : vector<8x64xf32>, vector<64x128xf32>, vector<8x128xf32> -> vector<8x128xf32>
    %9 = vector.broadcast %6 : vector<8x1xf32> to vector<8x128xf32>
    %10 = arith.mulf %8, %9 : vector<8x128xf32>
    %11 = vector.broadcast %2 : vector<1x128xf32> to vector<8x128xf32>
    %12 = arith.mulf %10, %11 : vector<8x128xf32>
    %cst_6 = arith.constant -1.000000e+00 : f32
    %cst_7 = arith.constant 1.000000e+00 : f32
    %13 = vector.broadcast %cst_6 : f32 to vector<8x128xf32>
    %14 = arith.maximumf %13, %12 : vector<8x128xf32>
    %15 = vector.broadcast %cst_7 : f32 to vector<8x128xf32>
    %16 = arith.minimumf %15, %14 : vector<8x128xf32>
    %17 = arith.mulf %16, %16 : vector<8x128xf32>
    %cst_8 = arith.constant 8.000000e+00 : f32
    %18 = vector.broadcast %cst_8 : f32 to vector<8x128xf32>
    %19 = arith.mulf %18, %17 : vector<8x128xf32>
    %20 = arith.mulf %19, %17 : vector<8x128xf32>
    %cst_9 = arith.constant 8.000000e+00 : f32
    %21 = vector.broadcast %cst_9 : f32 to vector<8x128xf32>
    %22 = arith.mulf %21, %17 : vector<8x128xf32>
    %23 = arith.subf %20, %22 : vector<8x128xf32>
    %cst_10 = arith.constant 1.000000e+00 : f32
    %24 = vector.broadcast %cst_10 : f32 to vector<8x128xf32>
    %25 = arith.addf %23, %24 : vector<8x128xf32>
    %cst_11 = arith.constant 0.707106769 : f32
    %26 = vector.broadcast %cst_11 : f32 to vector<8x128xf32>
    %27 = arith.cmpf ole, %16, %26 : vector<8x128xf32>
    %28 = arith.extui %27 : vector<8x128xi1> to vector<8x128xi32>
    %cst_12 = arith.constant 6.12323426E-17 : f32
    %29 = vector.broadcast %cst_12 : f32 to vector<8x128xf32>
    %30 = arith.cmpf ole, %16, %29 : vector<8x128xf32>
    %31 = arith.extui %30 : vector<8x128xi1> to vector<8x128xi32>
    %32 = arith.addi %28, %31 : vector<8x128xi32>
    %cst_13 = arith.constant -0.707106769 : f32
    %33 = vector.broadcast %cst_13 : f32 to vector<8x128xf32>
    %34 = arith.cmpf ole, %16, %33 : vector<8x128xf32>
    %35 = arith.extui %34 : vector<8x128xi1> to vector<8x128xi32>
    %36 = arith.addi %32, %35 : vector<8x128xi32>
    %cst_14 = arith.constant -1.000000e+00 : f32
    %37 = vector.broadcast %cst_14 : f32 to vector<8x128xf32>
    %38 = arith.cmpf ole, %16, %37 : vector<8x128xf32>
    %39 = arith.extui %38 : vector<8x128xi1> to vector<8x128xi32>
    %40 = arith.addi %36, %39 : vector<8x128xi32>
    %41 = arith.sitofp %40 : vector<8x128xi32> to vector<8x128xf32>
    %c1_i32 = arith.constant 1 : i32
    %42 = vector.broadcast %c1_i32 : i32 to vector<8x128xi32>
    %43 = arith.andi %40, %42 : vector<8x128xi32>
    %c0_i32 = arith.constant 0 : i32
    %44 = vector.broadcast %c0_i32 : i32 to vector<8x128xi32>
    %45 = arith.cmpi eq, %43, %44 : vector<8x128xi32>
    %cst_15 = arith.constant 1.000000e+00 : f32
    %cst_16 = arith.constant -1.000000e+00 : f32
    %46 = vector.broadcast %cst_15 : f32 to vector<8x128xf32>
    %47 = vector.broadcast %cst_16 : f32 to vector<8x128xf32>
    %48 = arith.select %45, %46, %47 : vector<8x128xi1>, vector<8x128xf32>
    %49 = arith.mulf %48, %25 : vector<8x128xf32>
    %cst_17 = arith.constant 2.000000e+00 : f32
    %50 = vector.broadcast %cst_17 : f32 to vector<8x128xf32>
    %51 = arith.mulf %50, %41 : vector<8x128xf32>
    %52 = arith.subf %49, %51 : vector<8x128xf32>
    %53 = vector.broadcast %7 : vector<8x1xf32> to vector<8x128xf32>
    %54 = arith.mulf %16, %53 : vector<8x128xf32>
    %c0_18 = arith.constant 0 : index
    %c0_19 = arith.constant 0 : index
    %55 = vector.load %arg5[%c0_18, %c0_19] : memref<8x128xf32, #tpu.memory_space<vmem>>, vector<8x128xf32>
    tpu.vector_store %arg5[%c0_18, %c0_19], %54 {strides = array<i32>} : memref<8x128xf32, #tpu.memory_space<vmem>>, vector<8x128xf32>,
    %56 = vector.broadcast %7 : vector<8x1xf32> to vector<8x128xf32>
    %57 = arith.mulf %52, %56 : vector<8x128xf32>
    %c0_20 = arith.constant 0 : index
    %c0_21 = arith.constant 0 : index
    %58 = vector.load %arg6[%c0_20, %c0_21] : memref<8x128xf32, #tpu.memory_space<vmem>>, vector<8x128xf32>
    tpu.vector_store %arg6[%c0_20, %c0_21], %57 {strides = array<i32>} : memref<8x128xf32, #tpu.memory_space<vmem>>, vector<8x128xf32>,
    return
  }
  func.func @transform_0(%arg0: i32, %arg1: i32) -> (i32, i32) {
    %c0_i32 = arith.constant 0 : i32
    %c0_i32_0 = arith.constant 0 : i32
    return %arg0, %c0_i32 : i32, i32
  }
  func.func @transform_1(%arg0: i32, %arg1: i32) -> (i32, i32) {
    %c0_i32 = arith.constant 0 : i32
    %c0_i32_0 = arith.constant 0 : i32
    return %c0_i32, %arg1 : i32, i32
  }
  func.func @transform_2(%arg0: i32, %arg1: i32) -> (i32, i32) {
    %c0_i32 = arith.constant 0 : i32
    %c0_i32_0 = arith.constant 0 : i32
    return %c0_i32, %arg1 : i32, i32
  }
  func.func @transform_3(%arg0: i32, %arg1: i32) -> (i32, i32) {
    %c0_i32 = arith.constant 0 : i32
    return %arg0, %arg1 : i32, i32
  }
  func.func @transform_4(%arg0: i32, %arg1: i32) -> (i32, i32) {
    %c0_i32 = arith.constant 0 : i32
    return %arg0, %arg1 : i32, i32
  }
}

</mosaic_0001>

<bundles_post_ra>
// kernel: tpu_custom_call.1
= control target key start
LH: loop header
LB: loop body
LE: loop exit
PB: predicated region body
PF: predicated region fallthrough
CT: control target
= control target key end

     0   :  { %s1379_s0 = inlined_call_operand.hbm [shape: f32[16,64], index: 0, kind: input, shape index: {}]   ;;  %s1380_s1 = inlined_call_operand.hbm [shape: f32[64,256], index: 1, kind: input, shape index: {}]   ;;  %s1381_s2 = inlined_call_operand.hbm [shape: f32[1,256], index: 2, kind: input, shape index: {}]   ;;  %s1382_s3 = inlined_call_operand.hbm [shape: f32[16,256], index: 3, kind: output, shape index: {0}]   ;;  %s1383_s4 = inlined_call_operand.hbm [shape: f32[16,256], index: 4, kind: output, shape index: {1}]  }
   0x1   :  { %1397 = sst [smem:[#allocation27_spill]] %s1380_s1 }
   0x2   :  { %1398 = sst [smem:[#allocation28_spill]] %s1382_s3 }
   0x3   :  { %1399 = sst [smem:[#allocation29_spill]] %s1383_s4 }
   0x4   :  { %10 = vsyncpa [#allocation3], 0 }
   0x5   :  { %12 = vsyncpa [#allocation3 + $0x1], 0 }
   0x6   :  { %13 = vsyncpa [#allocation6], 0 }
   0x7   :  { %15 = vsyncpa [#allocation6 + $0x1], 0 }
   0x8   :  { %16 = vsyncpa [#allocation4], 0 }
   0x9   :  { %18 = vsyncpa [#allocation4 + $0x1], 0 }
   0xa   :  { %19 = vsyncpa [#allocation10], 0 }
   0xb   :  { %21 = vsyncpa [#allocation10 + $0x1], 0  ;;  %s1081_s15 = smov 0   ;;  %s1083_s16 = smov 0  }
   0xc   :  { %s1085_s17 = smov 0   ;;  %s1087_s18 = smov 0  }
   0xd   :  { %s1089_s19 = smov 0   ;;  %s1091_s20 = smov 0  }
   0xe   :  { %s1093_s21 = smov 0   ;;  %s1095_s22 = smov 0  }
   0xf   :  { %s1097_s23 = smov 0   ;;  %s1099_s24 = smov 0  }
  0x10   :  { %s1101_s25 = smov 0   ;;  %s1103_s26 = smov 0  }
  0x11   :  { %s1105_s27 = smov 0   ;;  %s1107_s28 = smov 0  }
  0x12 LB: > { %1400 = sst [smem:[#allocation15_spill]] %s997_s15  ;;  %p54_p0 = scmp.eq.s32.totalorder %s1049_s28, 0  ;;  %s1049_s28 = sphi %s1107_s28, %s27_s28   ;;  %s1045_s27 = sphi %s1105_s27, %s1449_s27   ;;  %s1041_s26 = sphi %s1103_s26, %s1448_s26   ;;  %s1037_s25 = sphi %s1101_s25, %s1437_s25   ;;  %s1033_s24 = sphi %s1099_s24, %s1447_s24   ;;  %s1029_s23 = sphi %s1097_s23, %s1436_s23   ;;  %s1025_s22 = sphi %s1095_s22, %s1446_s22   ;;  %s1021_s21 = sphi %s1093_s21, %s1445_s21   ;;  %s1017_s20 = sphi %s1091_s20, %s1444_s20   ;;  %s1013_s19 = sphi %s1089_s19, %s1443_s19   ;;  %s1009_s18 = sphi %s1087_s18, %s1442_s18   ;;  %s1005_s17 = sphi %s1085_s17, %s1441_s17   ;;  %s1001_s16 = sphi %s1083_s16, %s1432_s16   ;;  %s997_s15 = sphi %s1081_s15, %s1431_s15  }
  0x13   : > { %1401 = sst [smem:[#allocation16_spill]] %s1001_s16  ;;  %p79_p1 = scmp.ne.s32.totalorder %s1017_s20, %s1013_s19 }
  0x14   : > { %1402 = sst [smem:[#allocation17_spill]] %s1005_s17  ;;  %p655_p2 = scmp.lt.s32.totalorder %s1049_s28, 4 }
  0x15   : > { %1403 = sst [smem:[#allocation18_spill]] %s1029_s23  ;;  %s210_s30 = sand.u32 1, %s1049_s28  }
  0x16   : > { %1404 = sst [smem:[#allocation19_spill]] %s1045_s27  ;;  %p81_p3 = por %p79_p1, %p54_p0 }
  0x17   : > { %s1384_s5 = sand.u32 1, %s1017_s20   ;;  %s612_s6 = sshll.u32 %s1041_s26, 3 }
  0x18   : > { %s611_s7 = sshll.u32 %s1384_s5, 6  ;;  %s1405_s1 = sld [smem:[#allocation27_spill]] }
  0x19   : > { %s214_s12 = scalar_lea.vmem [#allocation5], %s611_s7  ;;  %p1168_p4 = pnand %p655_p2, %p81_p3 }
  0x1a   : > { %s221_s13 = sshll.u32 %s214_s12, 4  ;;  %s1172_s8 = scalar_lea.sflag [#allocation6], %s210_s30  ;;  %s222_s13 = int_to_ptr.vmem [resolvable:$true] %s221_s13 }
  0x1b   : > { %s1052_s9 = smov 128   ;;  %s1053_s7 = smov 8  }
  0x1c   : > { %p613_p5 = scmp.ge.s32.totalorder %s1049_s28, 1  ;;  %p246_p6 = scmp.lt.s32.totalorder %s1049_s28, 5 }
  0x1d   : > { %s1184_s30 = sadd.s32 4294967295, %s1049_s28   ;;  %s36_s5 = sadd.s32 1, %s1041_s26 }
  0x1e   : > { %s218_s10 = scalar_lea.hbm %s1405_s1, %s612_s6  ;;  %s1051_s6 = smov 256  }
  0x1f   : > { %s219_s11 = sshll.u32 %s218_s10, 4  ;;  %p1179_p7 = pnand %p613_p5, %p246_p6  ;;  %s220_s11 = int_to_ptr.hbm [resolvable:$true] %s219_s11 }
  0x20   : > { %644 = dma.hbm_to_vmem [thread:$0]  (!%p1168_p4), %s220_s11, 1024, %s222_s13, %s1172_s8, %s1051_s6, %s1052_s9, %s1053_s7  }
  0x21   : > { %p37_p8 = scmp.ge.s32.totalorder %s36_s5, 2  ;;  %s39_s29 = sadd.s32 1, %s1045_s27 }
  0x22   : > { %s46_s1 = sadd.s32 1, %s1029_s23  ;;  %p53_p9 = scmp.ne.s32.totalorder %s1029_s23, %s1025_s22 }
  0x23   : > { %s1451_s5 = smov (%p37_p8, %s36_s5), 0  ;;  %s1453_s29 = smov (!%p37_p8, %s39_s29), %s1045_s27 }
  0x24   : > { %1408 = sst [smem:[#allocation20_spill]] %s1451_s5  ;;  %p1197_p10 = por %p54_p0, %p53_p9 }
  0x25   : > { %p59_p11 = scmp.ne.s32.totalorder %s1025_s22, %s1021_s21  ;;  %p41_p12 = scmp.ge.s32.totalorder %s1453_s29, 2 }
  0x26   : > { %p60_p13 = scmp.eq.s32.totalorder %s1184_s30, 0  ;;  %s69_s13 = ssub.s32 %s1041_s26, %s1451_s5 }
  0x27   : > { %p85_p1 = scmp.ne.s32.totalorder %s1013_s19, %s1009_s18  ;;  %s1455_s29 = smov (%p41_p12, %s1453_s29), 0 }
  0x28   : > { %1410 = sst [smem:[#allocation21_spill]] %s1455_s29  ;;  %p1210_p0 = por %p60_p13, %p59_p11 }
  0x29   : > { %p70_p3 = scmp.eq.s32.totalorder %s69_s13, 0  ;;  %s43_s21 = ssub.s32 %s1045_s27, %s1455_s29 }
  0x2a   : > { %p1216_p5 = por %p85_p1, %p60_p13  ;;  %p44_p6 = scmp.eq.s32.totalorder %s43_s21, 0 }
  0x2b   : > { %s123_s18 = sor.u32 %s69_s13, %s43_s21  ;;  %s1413_s7 = sadd.s32 1, %s1017_s20 }
  0x2c   : > { %s1223_s12 = scalar_select %p70_p3, %s1017_s20, %s1413_s7  }
  0x2d   : > { %s1226_s5 = scalar_select %p44_p6, %s1029_s23, %s46_s1  }
  0x2e   : > { %1414 = sst [smem:[#allocation22_spill]] %s1223_s12  ;;  %p124_p8 = scmp.eq.s32.totalorder %s123_s18, 0 }
  0x2f   : > { %1415 = sst [smem:[#allocation23_spill]] %s1226_s5  ;;  %s126_s4 = sadd.s32 1, %s1005_s17 }
  0x30   : > { %p136_p9 = scmp.ne.s32.totalorder %s1005_s17, %s1001_s16  ;;  %p137_p11 = scmp.eq.s32.totalorder %s1184_s30, 3 }
  0x31   : > { %s1233_s29 = scalar_select %p124_p8, %s1005_s17, %s126_s4  }
  0x32   : > { %p1235_p12 = por %p137_p11, %p136_p9  ;;  %p142_p13 = scmp.ne.s32.totalorder %s1001_s16, %s997_s15 }
  0x33   : > { %1416 = sst [smem:[#allocation24_spill]] %s1233_s29  ;;  %s1419_s13 = sadd.s32 4294967294, %s1049_s28  }
  0x34   : > { %s1417_s3 = scalar_select %p1235_p12, 1, 0 }
  0x35   : > { %p143_p1 = scmp.eq.s32.totalorder %s1419_s13, 3  ;;  %s191_s21 = sand.u32 1, %s1029_s23  }
  0x36   : > { %1418 = sst [smem:[#allocation25_spill]] %s1417_s3  ;;  %s609_s1 = sshll.u32 %s191_s21, 3 }
  0x37   : > { %p1244_p3 = por %p143_p1, %p142_p13  ;;  %s610_s7 = sshll.u32 %s1045_s27, 3 }
  0x38   : > { %s195_s5 = scalar_lea.vmem [#allocation2], %s609_s1  ;;  %s199_s17 = scalar_lea.hbm %s1379_s0, %s610_s7 }
  0x39   : > { %s1420_s18 = scalar_select %p1244_p3, 1, 0 }
  0x3a   : > { %s203_s4 = sshll.u32 %s195_s5, 4  ;;  %s201_s15 = sshll.u32 %s199_s17, 4  ;;  %s204_s4 = int_to_ptr.vmem [resolvable:$true] %s203_s4  ;;  %s202_s15 = int_to_ptr.hbm [resolvable:$true] %s201_s15 }
  0x3b   : > { %1421 = sst [smem:[#allocation26_spill]] %s1420_s18  ;;  %p639_p6 = pnand %p655_p2, %p1197_p10 }
  0x3c   : > { %s237_s3 = scalar_lea.hbm %s1381_s2, %s1041_s26  ;;  %s192_s18 = scalar_lea.sflag [#allocation3], %s191_s21 }
  0x3d   : > { %641 = dma.hbm_to_vmem [thread:$0]  (!%p639_p6), %s202_s15, 128, %s204_s4, %s192_s18  }
  0x3e   : > { %s239_s27 = sshll.u32 %s237_s3, 4  ;;  %s1422_s16 = sand.u32 1, %s1017_s20   ;;  %s240_s27 = int_to_ptr.hbm [resolvable:$true] %s239_s27 }
  0x3f   : > { %s234_s1 = scalar_lea.vmem [#allocation7], %s1422_s16  ;;  %250 = sbr.rel (%p1179_p7) target bundleno = 246 (0xf6), region = 32 }
  0x40   : > { %s241_s5 = sshll.u32 %s234_s1, 4  ;;  %s252_s17 = sand.u32 (!%p1179_p7), 1, %s1025_s22   ;;  %s242_s5 = int_to_ptr.vmem [resolvable:$true] %s241_s5 }
  0x41   : > { %647 = dma.hbm_to_vmem [thread:$0]  (!%p1168_p4), %s240_s27, 16, %s242_s5, %s1172_s8  }
  0x42   : > { %s614_s29 = sshll.u32 (!%p1179_p7), %s252_s17, 3  ;;  %s253_s12 = scalar_lea.sflag (!%p1179_p7), [#allocation3], %s252_s17 }
  0x43   : > { %s256_s23 = scalar_lea.vmem (!%p1179_p7), [#allocation2], %s614_s29 }
  0x44   : > { %980 = dma.done.wait (%p1210_p0), %s253_s12, 128  }
  0x45   : > { %982 = vsyncadd (%p1210_p0), %s253_s12, 4294967168  ;;  %s262_s3 = sand.u32 1, %s1184_s30   ;;  %s264_s15 = sand.u32 1, %s1013_s19  }
  0x46   : > { %s615_s16 = sshll.u32 %s264_s15, 6  ;;  %s263_s27 = scalar_lea.sflag [#allocation6], %s262_s3 }
  0x47   : > { %s266_s14 = scalar_lea.vmem [#allocation5], %s615_s16 }
  0x48   : > { %984 = dma.done.wait (%p1216_p5), %s263_s27, 1040  }
  0x49   : > { %986 = vsyncadd (%p1216_p5), %s263_s27, 4294966256  ;;  %v323_v0 = vld [vmem:[%s266_s14 + $0x38] sm:$0xff]  ;;  %v322_v1 = vld [vmem:[%s266_s14 + $0x30] sm:$0xff]  ;;  %vm326_vm0 = vcmask 523264   ;;  %s275_s8 = scalar_lea.vmem [#allocation7], %s264_s15  ;;  %s1423_s10 = sld [smem:[#allocation16_spill]] }
  0x4a   : > { %v315_v2 = vld [vmem:[%s256_s23] sm:$0xff]  ;;  %363 = vmatpush.msra.mxu0 %v323_v0  ;;  %v321_v4 = vld [vmem:[%s266_s14 + $0x28] sm:$0xff]  ;;  %v320_v6 = vld [vmem:[%s266_s14 + $0x20] sm:$0xff]  ;;  %s622_s30 = sshll.u32 %s1037_s25, 1  ;;  %s1424_s18 = sld [smem:[#allocation28_spill]]  ;;  %v1054_v30 = vmov 0  }
  0x4b   : > { %v325_v3 = vmul.f32 %v315_v2, %v315_v2  ;;  %v319_v7 = vld [vmem:[%s266_s14 + $0x18] sm:$0xff]  ;;  %v318_v8 = vld [vmem:[%s266_s14 + $0x10] sm:$0xff]  ;;  %v317_v9 = vld [vmem:[%s266_s14 + $0x8] sm:$0xff]  ;;  %s1282_s11 = sadd.s32 %s1033_s24, %s622_s30 }
  0x4c   : > { %364 = vmatpush.msra.mxu0 %v322_v1  ;;  %v316_v10 = vld [vmem:[%s266_s14] sm:$0xff]  ;;  %s623_s9 = sshll.u32 %s1282_s11, 3  ;;  %v774_v19 = vld [vmem:[%s275_s8] ss:$0 sm:$0xff] }
  0x4d   : > { %v327_v5 = vsel %vm326_vm0, %v325_v3, 0.0 }
  0x4e   : > { %328 = vadd.xlane.f32.xlu0 %v327_v5  ;;  %365 = vmatpush.msra.mxu0 %v321_v4 }
  0x4f   : > { %s1285_s6 = sand.u32 1, %s1423_s10  }
  0x50   : > { %366 = vmatpush.msra.mxu0 %v320_v6  ;;  %s616_s21 = sshll.u32 %s1285_s6, 3  ;;  %s1425_s7 = smov %s1424_s18 }
  0x51   : > { %s427_s4 = scalar_lea.hbm %s1424_s18, %s623_s9  ;;  %s307_s13 = scalar_lea.vmem [#allocation8], %s616_s21 }
  0x52   : > { %367 = vmatpush.msra.mxu0 %v319_v7  ;;  %s429_s1 = sshll.u32 %s307_s13, 4  ;;  %s431_s5 = sshll.u32 %s427_s4, 4  ;;  %s430_s1 = int_to_ptr.vmem [resolvable:$true] %s429_s1  ;;  %s432_s5 = int_to_ptr.hbm [resolvable:$true] %s431_s5 }
  0x53   : > { %s410_s29 = scalar_lea.sflag [#allocation4], %s1285_s6  ;;  %s881_s12 = sshra.s32 %s432_s5, 4  ;;  %s882_s12 = int_to_ptr.hbm [resolvable:$true] %s881_s12 }
  0x54   : > { %368 = vmatpush.msra.mxu0 %v318_v8  ;;  %s883_s23 = scalar_lea.hbm %s882_s12, 8  ;;  %s887_s16 = scalar_lea.hbm %s1425_s7, 32 }
  0x55   : > { %p884_p2 = scmp.ne.s32.totalorder %s882_s12, %s883_s23  ;;  %p888_p10 = scmp.lt.s32.totalorder %s882_s12, %s1425_s7 }
  0x56   : > { %369 = vmatpush.msra.mxu0 %v317_v9  ;;  %p889_p0 = scmp.lt.s32.totalorder %s887_s16, %s883_s23 }
  0x57   : > { %p885_p4 = pnand %p884_p2, %p1235_p12 }
  0x58   : > { %370 = vmatpush.msra.mxu0 %v316_v10  ;;  %p890_p5 = por %p889_p0, %p888_p10 }
  0x59   : > { %618 = vmatmul.msk.f32.vlgmr.msra.gmra.mxu0 %vm326_vm0, %v315_v2  ;;  %p886_p7 = pneg %p885_p4 }
  0x5b   : > { %p891_p8 = pnand %p890_p5, %p886_p7 }
  0xc1   : > { %v329_v11 = vpop.xlane.xlu0 %328 }
  0xc2   : > { %775 = vrsqrt.f32 %v329_v11  ;;  %vm336_vm2 = vweird.f32 %v329_v11  ;;  %vm347_vm4 = vcmp.eq.f32.partialorder %v329_v11, inf  ;;  %v350_v25 = vand.u32 2147483648, %v329_v11 }
  0xc3   : > { %vm349_vm5 = vcmp.eq.f32.partialorder %v329_v11, 0.0 }
  0xc8   : > { %v776_v12 = vpop.eup %775 }
  0xc9   : > { %v331_v13 = vmul.f32 %v776_v12, %v329_v11  ;;  %vm337_vm1 = vweird.f32 %v776_v12 }
  0xca   : > { %vm338_vm3 = vmor %vm336_vm2, %vm337_vm1 }
  0xcb   : > { %v332_v14 = vmul.f32 %v776_v12, %v331_v13 }
  0xcd   : > { %v333_v15 = vmul.f32 0.5, %v332_v14 }
  0xcf   : > { %v334_v16 = vsub.f32 1.5, %v333_v15 }
  0xd1   : > { %v335_v17 = vmul.f32 %v776_v12, %v334_v16 }
  0xd3   : > { %v346_v18 = vmul.f32 %v335_v17, %v329_v11  ;;  %v339_v20 = vsel %vm338_vm3, %v776_v12, %v335_v17 }
  0xd5   : > { %v348_v23 = vsel %vm347_vm4, %v329_v11, %v346_v18 }
  0xd6   : > { %v372_v21 = vpop.f32.mrf.mxu0  ;;  %v351_v27 = vsel %vm349_vm5, %v350_v25, %v348_v23 }
  0xd7   : > { %v375_v22 = vmul.f32 %v372_v21, %v339_v20 }
  0xd9   : > { %v379_v24 = vmul.f32 %v774_v19, %v375_v22 }
  0xdb   : > { %v619_v26 = vclamps-f32 %v379_v24, 1.0 }
  0xdd   : > { %vm387_vm6 = vcmp.le.f32.partialorder %v619_v26, 0.70710677  ;;  %vm389_vm7 = vcmp.le.f32.partialorder %v619_v26, 6.123234e-17  ;;  %v405_v28 = vmul.f32 %v619_v26, %v351_v27  ;;  %v382_v29 = vmul.f32 %v619_v26, %v619_v26 }
  0xde   : > { %v388_v31 = vsel %vm387_vm6, 1, %v1054_v30  ;;  %v390_v32 = vsel %vm389_vm7, 1, %v1054_v30  ;;  %vm392_vm8 = vcmp.le.f32.partialorder %v619_v26, -0.70710677  ;;  %vm395_vm9 = vcmp.le.f32.partialorder %v619_v26, -1.0 }
  0xdf   : > { %406 = vst [vmem:[%s307_s13] sm:$0xff] %v405_v28  ;;  %v383_v33 = vmul.f32 8.0, %v382_v29  ;;  %v391_v34 = vadd.s32 %v390_v32, %v388_v31 }
  0xe0   : > { %894 = shalt.err (!%p891_p8)
}
  0xe1   : > { %634 = dma.vmem_to_hbm [thread:$0]  (%p1235_p12), %s430_s1, 128, %s432_s5, %s410_s29   ;;  %v393_v35 = vsel %vm392_vm8, 1, %v1054_v30  ;;  %v384_v36 = vmul.f32 %v383_v33, %v382_v29  ;;  %v396_v38 = vsel %vm395_vm9, 1, %v1054_v30  ;;  %v1055_v44 = vmov -1.0  }
  0xe2   : > { %v394_v37 = vadd.s32 %v393_v35, %v391_v34  ;;  %s1427_s30 = sld [smem:[#allocation29_spill]]  ;;  %s314_s24 = scalar_lea.vmem [#allocation9], %s616_s21 }
  0xe3   : > { %v385_v39 = vsub.f32 %v384_v36, %v383_v33  ;;  %s445_s18 = sshll.u32 %s314_s24, 4  ;;  %s415_s13 = scalar_lea.sflag [#allocation10], %s1285_s6  ;;  %s446_s18 = int_to_ptr.vmem [resolvable:$true] %s445_s18 }
  0xe4   : > { %v397_v40 = vadd.s32 %v396_v38, %v394_v37 }
  0xe5   : > { %v386_v43 = vadd.f32 1.0, %v385_v39 }
  0xe6   : > { %v398_v41 = vcvt.s32.f32 %v397_v40  ;;  %v399_v42 = vand.u32 1, %v397_v40 }
  0xe8   : > { %vm400_vm10 = vcmp.eq.s32.totalorder %v399_v42, 0  ;;  %s443_s25 = scalar_lea.hbm %s1427_s30, %s623_s9  ;;  %v403_v47 = vmul.f32 2.0, %v398_v41  ;;  %s915_s29 = scalar_lea.hbm %s1427_s30, 32 }
  0xe9   : > { %v401_v45 = vsel %vm400_vm10, 1.0, %v1055_v44  ;;  %s447_s4 = sshll.u32 %s443_s25, 4  ;;  %s448_s4 = int_to_ptr.hbm [resolvable:$true] %s447_s4 }
  0xea   : > { %v402_v46 = vmul.f32 %v401_v45, %v386_v43  ;;  %s909_s11 = sshra.s32 %s448_s4, 4  ;;  %s910_s11 = int_to_ptr.hbm [resolvable:$true] %s909_s11 }
  0xeb   : > { %s911_s1 = scalar_lea.hbm %s910_s11, 8  ;;  %p916_p1 = scmp.lt.s32.totalorder %s910_s11, %s1427_s30 }
  0xec   : > { %v404_v48 = vsub.f32 %v402_v46, %v403_v47  ;;  %p912_p9 = scmp.ne.s32.totalorder %s910_s11, %s911_s1  ;;  %p917_p6 = scmp.lt.s32.totalorder %s915_s29, %s911_s1 }
  0xee   : > { %v407_v49 = vmul.f32 %v404_v48, %v351_v27  ;;  %p913_p11 = pnand %p912_p9, %p1235_p12  ;;  %p918_p2 = por %p917_p6, %p916_p1 }
  0xf0   : > { %408 = vst [vmem:[%s314_s24] sm:$0xff] %v407_v49  ;;  %p914_p13 = pneg %p913_p11 }
  0xf2   : > { %p919_p4 = pnand %p918_p2, %p914_p13 }
  0xf4   : > { %922 = shalt.err (!%p919_p4)
}
  0xf5   : > { %635 = dma.vmem_to_hbm [thread:$0]  (%p1235_p12), %s446_s18, 128, %s448_s4, %s415_s13  }
  0xf6 PF: > { %s1428_s6 = sld [smem:[#allocation15_spill]]  ;;  %p656_p7 = scmp.ge.s32.totalorder %s1049_s28, 2 }
  0xf8   : > { %p649_p10 = pnand %p656_p7, %p1244_p3 }
  0xfa   : > { %p650_p0 = pneg %p649_p10 }
  0xfc   : > { %s459_s3 = sand.u32 1, %s1428_s6  }
  0xfd   : > { %s460_s15 = scalar_lea.sflag [#allocation4], %s459_s3 }
  0xfe   : > { %988 = dma.done.wait (%p650_p0), %s460_s15, 128  }
  0xff   : > { %990 = vsyncadd (%p650_p0), %s460_s15, 4294967168  ;;  %s470_s16 = scalar_lea.sflag [#allocation10], %s459_s3 }
 0x100   : > { %992 = dma.done.wait (%p650_p0), %s470_s16, 128  }
 0x101   : > { %994 = vsyncadd (%p650_p0), %s470_s16, 4294967168  ;;  %s27_s28 = sadd.s32 1, %s1049_s28   ;;  %s1431_s15 = sld [smem:[#allocation16_spill]] }
 0x102   : > { %p1332_p5 = scmp.ge.s32.totalorder %s27_s28, 6   ;;  %s1432_s16 = sld [smem:[#allocation17_spill]] }
 0x103   : > { %s1433_s27 = sld [smem:[#allocation24_spill]]  ;;  %s1442_s18 = smov %s1013_s19 }
 0x104   : > { %s1434_s14 = sld [smem:[#allocation22_spill]]  ;;  %s1443_s19 = smov %s1017_s20 }
 0x105   : > { %s1435_s8 = sld [smem:[#allocation18_spill]]  ;;  %s1445_s21 = smov %s1025_s22 }
 0x106   : > { %s1436_s23 = sld [smem:[#allocation23_spill]]  ;;  %s1447_s24 = smov %s1041_s26 }
 0x107   : > { %s1437_s25 = sld [smem:[#allocation19_spill]] }
 0x108   : > { %s1438_s10 = sld [smem:[#allocation20_spill]] }
 0x109   : > { %s1439_s4 = sld [smem:[#allocation21_spill]]  ;;  %s1441_s17 = smov %s1433_s27 }
 0x10a   : > { %s1444_s20 = smov %s1434_s14 }
 0x10b   : > { %s1446_s22 = smov %s1435_s8  ;;  %26 = sbr.rel (!%p1332_p5) target bundleno = 18 (0x12), region = 118 }
 0x10e   : > { %s1448_s26 = smov %s1438_s10 }
 0x10f   : > { %s1449_s27 = smov %s1439_s4 }
 0x110   :  { %476 = vsyncpa [#allocation3], 1 }
 0x111   :  { %478 = vsyncpa [#allocation3 + $0x1], 1 }
 0x112   :  { %479 = vsyncpa [#allocation6], 1 }
 0x113   :  { %481 = vsyncpa [#allocation6 + $0x1], 1 }
 0x114   :  { %482 = vsyncpa [#allocation4], 1 }
 0x115   :  { %484 = vsyncpa [#allocation4 + $0x1], 1 }
 0x116   :  { %485 = vsyncpa [#allocation10], 1 }
 0x117   :  { %487 = vsyncpa [#allocation10 + $0x1], 1 }

</bundles_post_ra>
